<compile_context>
chip_gen: v7x
topology: tpu7x:2x2x1
jax: 0.10.0
libtpu: 0.0.40
codegen_flags: <defaults>
</compile_context>

<pallas_src>
import jax
import jax.numpy as jnp
from jax.experimental import pallas as pl
from jax.experimental.pallas import tpu as pltpu


def _rnn_kernel(x_ref, wih_ref, b_ref, whh_ref, wout_ref, out_ref):
    """Single invocation: whole sequence.

    x_ref   : (T*Bp, D_in)   time-major, batch padded to Bp (multiple of 8 sublanes)
    wih_ref : (D_in, H)      W_ih^T
    b_ref   : (1, H)         b_ih + b_hh (fused)
    whh_ref : (H, H)         W_hh^T
    wout_ref: (H, Dp)        W_out^T zero-padded to Dp lanes (multiple of 128)
    out_ref : (Bp, Dp)
    """
    TB = x_ref.shape[0]
    Bp = out_ref.shape[0]
    H = whh_ref.shape[0]
    T = TB // Bp

    # (1) Hoisted input projection for the whole sequence: one MXU matmul + fused
    #     bias.  Result stays as a traced value (vregs), no VMEM scratch round-trip.
    xp = (
        jnp.dot(x_ref[...], wih_ref[...], preferred_element_type=jnp.float32)
        + b_ref[...]
    )

    whh = whh_ref[...]

    # (2) Recurrence, fully unrolled with static, sublane-aligned slices of xp.
    #     h (Bp, H) lives in vregs for the whole chain.
    h = jnp.zeros((Bp, H), jnp.float32)
    for t in range(T):
        xp_t = xp[t * Bp:(t + 1) * Bp, :]  # static, 8-row-aligned slice
        h = jnp.maximum(
            xp_t + jnp.dot(h, whh, preferred_element_type=jnp.float32), 0.0
        )

    # (3) Final projection (Linear, bias=False) on the last hidden state.
    #     Lane-dense (Dp multiple of 128) -> unmasked store.
    out_ref[...] = jnp.dot(
        h, wout_ref[...], preferred_element_type=jnp.float32
    ).astype(out_ref.dtype)


def elman_rnn_forward(x, w_ih, b_ih, w_hh, b_hh, w_out):
    """x: (B, T, D_in) float32.  Returns (B, D_out) float32."""
    B, T, D_in = x.shape
    H = w_hh.shape[0]
    D_out = w_out.shape[0]

    # Pad batch to the sublane count (8) and output lanes to 128 for aligned,
    # unmasked per-step loads and a lane-dense final store.  Padding is sliced
    # off below (padded rows carry relu(bias) != 0, so they MUST be discarded).
    Bp = ((B + 7) // 8) * 8
    Dp = ((D_out + 127) // 128) * 128

    # Time-major so each step's Bp rows are contiguous and 8-aligned.
    # (At production T*B*D_in sizes this transpose should be folded into the
    #  kernel / BlockSpec index_map instead of a separate XLA op.)
    x_tb = jnp.transpose(x, (1, 0, 2))                         # (T, B, D_in)
    x_tb = jnp.pad(x_tb, ((0, 0), (0, Bp - B), (0, 0)))        # (T, Bp, D_in)
    x_flat = x_tb.reshape(T * Bp, D_in)

    wih_t = jnp.transpose(w_ih)                                # (D_in, H)
    whh_t = jnp.transpose(w_hh)                                # (H, H)
    wout_t = jnp.transpose(w_out)                              # (H, D_out)
    wout_p = jnp.pad(wout_t, ((0, 0), (0, Dp - D_out)))        # (H, Dp) lane-dense
    b = (b_ih + b_hh).reshape(1, H)                            # fused bias

    vmem = pltpu.MemorySpace.VMEM
    out_pad = pl.pallas_call(
        _rnn_kernel,
        out_shape=jax.ShapeDtypeStruct((Bp, Dp), jnp.float32),
        in_specs=[
            pl.BlockSpec(memory_space=vmem),  # x (T*Bp, D_in)
            pl.BlockSpec(memory_space=vmem),  # W_ih^T
            pl.BlockSpec(memory_space=vmem),  # fused bias
            pl.BlockSpec(memory_space=vmem),  # W_hh^T
            pl.BlockSpec(memory_space=vmem),  # W_out^T (lane-padded)
        ],
        out_specs=pl.BlockSpec(memory_space=vmem),
    )(x_flat, wih_t, b, whh_t, wout_p)

    return out_pad[:B, :D_out]


def _reference(x, w_ih, b_ih, w_hh, b_hh, w_out):
    B, T, _ = x.shape
    H = w_hh.shape[0]
    h = jnp.zeros((B, H), jnp.float32)
    for t in range(T):
        h = jnp.maximum(x[:, t] @ w_ih.T + b_ih + h @ w_hh.T + b_hh, 0.0)
    return h @ w_out.T


if __name__ == "__main__":
    # Small shapes consistent with the module's forward:
    #   batch=2, seq=8, input_size=16, state_size=32, output_size=4
    B, T, D_in, H, D_out = 2, 8, 16, 32, 4

    key = jax.random.PRNGKey(0)
    k = jax.random.split(key, 6)
    scale = 1.0 / jnp.sqrt(H)
    x = jax.random.normal(k[0], (B, T, D_in), jnp.float32)
    w_ih = jax.random.uniform(k[1], (H, D_in), jnp.float32, -scale, scale)
    b_ih = jax.random.uniform(k[2], (H,), jnp.float32, -scale, scale)
    w_hh = jax.random.uniform(k[3], (H, H), jnp.float32, -scale, scale)
    b_hh = jax.random.uniform(k[4], (H,), jnp.float32, -scale, scale)
    w_out = jax.random.uniform(k[5], (D_out, H), jnp.float32, -scale, scale)

    out = elman_rnn_forward(x, w_ih, b_ih, w_hh, b_hh, w_out)
    out = jax.block_until_ready(out)

    ref = _reference(x, w_ih, b_ih, w_hh, b_hh, w_out)
    assert out.shape == (B, D_out)
    assert jnp.allclose(out, ref, atol=1e-5, rtol=1e-5), "mismatch vs reference"
    print("KERNEL_OK")
</pallas_src>

<mosaic_0001>
module attributes {stable_mosaic.version = 11 : i64} {
  func.func @_rnn_kernel(%arg0: memref<64x16xf32, #tpu.memory_space<vmem>>, %arg1: memref<16x32xf32, #tpu.memory_space<vmem>>, %arg2: memref<1x32xf32, #tpu.memory_space<vmem>>, %arg3: memref<32x32xf32, #tpu.memory_space<vmem>>, %arg4: memref<32x128xf32, #tpu.memory_space<vmem>>, %arg5: memref<8x128xf32, #tpu.memory_space<vmem>>) attributes {dimension_semantics = [], scalar_prefetch = 0 : i64, scratch_operands = 0 : i64, tpu.core_type = #tpu.core_type<tc>} {
    %c0 = arith.constant 0 : index
    %c0_0 = arith.constant 0 : index
    %0 = vector.load %arg0[%c0, %c0_0] : memref<64x16xf32, #tpu.memory_space<vmem>>, vector<64x16xf32>
    %c0_1 = arith.constant 0 : index
    %c0_2 = arith.constant 0 : index
    %1 = vector.load %arg1[%c0_1, %c0_2] : memref<16x32xf32, #tpu.memory_space<vmem>>, vector<16x32xf32>
    %cst = arith.constant dense<0.000000e+00> : vector<64x32xf32>
    %2 = tpu.matmul %0, %1, %cst {dimension_numbers = #tpu.dot_dimension_numbers<[1], [0], [0], [1], [0, 0, 1, 1], [], []>} : vector<64x16xf32>, vector<16x32xf32>, vector<64x32xf32> -> vector<64x32xf32>
    %c0_3 = arith.constant 0 : index
    %c0_4 = arith.constant 0 : index
    %3 = vector.load %arg2[%c0_3, %c0_4] : memref<1x32xf32, #tpu.memory_space<vmem>>, vector<1x32xf32>
    %4 = vector.broadcast %3 : vector<1x32xf32> to vector<64x32xf32>
    %5 = arith.addf %2, %4 : vector<64x32xf32>
    %c0_5 = arith.constant 0 : index
    %c0_6 = arith.constant 0 : index
    %6 = vector.load %arg3[%c0_5, %c0_6] : memref<32x32xf32, #tpu.memory_space<vmem>>, vector<32x32xf32>
    %cst_7 = arith.constant 0.000000e+00 : f32
    %7 = vector.broadcast %cst_7 : f32 to vector<8x32xf32>
    %8 = vector.extract_strided_slice %5 {offsets = [0, 0], sizes = [8, 32], strides = [1, 1]} : vector<64x32xf32> to vector<8x32xf32>
    %cst_8 = arith.constant dense<0.000000e+00> : vector<8x32xf32>
    %9 = tpu.matmul %7, %6, %cst_8 {dimension_numbers = #tpu.dot_dimension_numbers<[1], [0], [0], [1], [0, 0, 1, 1], [], []>} : vector<8x32xf32>, vector<32x32xf32>, vector<8x32xf32> -> vector<8x32xf32>
    %10 = arith.addf %8, %9 : vector<8x32xf32>
    %cst_9 = arith.constant 0.000000e+00 : f32
    %11 = vector.broadcast %cst_9 : f32 to vector<8x32xf32>
    %12 = arith.maximumf %10, %11 : vector<8x32xf32>
    %13 = vector.extract_strided_slice %5 {offsets = [8, 0], sizes = [8, 32], strides = [1, 1]} : vector<64x32xf32> to vector<8x32xf32>
    %cst_10 = arith.constant dense<0.000000e+00> : vector<8x32xf32>
    %14 = tpu.matmul %12, %6, %cst_10 {dimension_numbers = #tpu.dot_dimension_numbers<[1], [0], [0], [1], [0, 0, 1, 1], [], []>} : vector<8x32xf32>, vector<32x32xf32>, vector<8x32xf32> -> vector<8x32xf32>
    %15 = arith.addf %13, %14 : vector<8x32xf32>
    %cst_11 = arith.constant 0.000000e+00 : f32
    %16 = vector.broadcast %cst_11 : f32 to vector<8x32xf32>
    %17 = arith.maximumf %15, %16 : vector<8x32xf32>
    %18 = vector.extract_strided_slice %5 {offsets = [16, 0], sizes = [8, 32], strides = [1, 1]} : vector<64x32xf32> to vector<8x32xf32>
    %cst_12 = arith.constant dense<0.000000e+00> : vector<8x32xf32>
    %19 = tpu.matmul %17, %6, %cst_12 {dimension_numbers = #tpu.dot_dimension_numbers<[1], [0], [0], [1], [0, 0, 1, 1], [], []>} : vector<8x32xf32>, vector<32x32xf32>, vector<8x32xf32> -> vector<8x32xf32>
    %20 = arith.addf %18, %19 : vector<8x32xf32>
    %cst_13 = arith.constant 0.000000e+00 : f32
    %21 = vector.broadcast %cst_13 : f32 to vector<8x32xf32>
    %22 = arith.maximumf %20, %21 : vector<8x32xf32>
    %23 = vector.extract_strided_slice %5 {offsets = [24, 0], sizes = [8, 32], strides = [1, 1]} : vector<64x32xf32> to vector<8x32xf32>
    %cst_14 = arith.constant dense<0.000000e+00> : vector<8x32xf32>
    %24 = tpu.matmul %22, %6, %cst_14 {dimension_numbers = #tpu.dot_dimension_numbers<[1], [0], [0], [1], [0, 0, 1, 1], [], []>} : vector<8x32xf32>, vector<32x32xf32>, vector<8x32xf32> -> vector<8x32xf32>
    %25 = arith.addf %23, %24 : vector<8x32xf32>
    %cst_15 = arith.constant 0.000000e+00 : f32
    %26 = vector.broadcast %cst_15 : f32 to vector<8x32xf32>
    %27 = arith.maximumf %25, %26 : vector<8x32xf32>
    %28 = vector.extract_strided_slice %5 {offsets = [32, 0], sizes = [8, 32], strides = [1, 1]} : vector<64x32xf32> to vector<8x32xf32>
    %cst_16 = arith.constant dense<0.000000e+00> : vector<8x32xf32>
    %29 = tpu.matmul %27, %6, %cst_16 {dimension_numbers = #tpu.dot_dimension_numbers<[1], [0], [0], [1], [0, 0, 1, 1], [], []>} : vector<8x32xf32>, vector<32x32xf32>, vector<8x32xf32> -> vector<8x32xf32>
    %30 = arith.addf %28, %29 : vector<8x32xf32>
    %cst_17 = arith.constant 0.000000e+00 : f32
    %31 = vector.broadcast %cst_17 : f32 to vector<8x32xf32>
    %32 = arith.maximumf %30, %31 : vector<8x32xf32>
    %33 = vector.extract_strided_slice %5 {offsets = [40, 0], sizes = [8, 32], strides = [1, 1]} : vector<64x32xf32> to vector<8x32xf32>
    %cst_18 = arith.constant dense<0.000000e+00> : vector<8x32xf32>
    %34 = tpu.matmul %32, %6, %cst_18 {dimension_numbers = #tpu.dot_dimension_numbers<[1], [0], [0], [1], [0, 0, 1, 1], [], []>} : vector<8x32xf32>, vector<32x32xf32>, vector<8x32xf32> -> vector<8x32xf32>
    %35 = arith.addf %33, %34 : vector<8x32xf32>
    %cst_19 = arith.constant 0.000000e+00 : f32
    %36 = vector.broadcast %cst_19 : f32 to vector<8x32xf32>
    %37 = arith.maximumf %35, %36 : vector<8x32xf32>
    %38 = vector.extract_strided_slice %5 {offsets = [48, 0], sizes = [8, 32], strides = [1, 1]} : vector<64x32xf32> to vector<8x32xf32>
    %cst_20 = arith.constant dense<0.000000e+00> : vector<8x32xf32>
    %39 = tpu.matmul %37, %6, %cst_20 {dimension_numbers = #tpu.dot_dimension_numbers<[1], [0], [0], [1], [0, 0, 1, 1], [], []>} : vector<8x32xf32>, vector<32x32xf32>, vector<8x32xf32> -> vector<8x32xf32>
    %40 = arith.addf %38, %39 : vector<8x32xf32>
    %cst_21 = arith.constant 0.000000e+00 : f32
    %41 = vector.broadcast %cst_21 : f32 to vector<8x32xf32>
    %42 = arith.maximumf %40, %41 : vector<8x32xf32>
    %43 = vector.extract_strided_slice %5 {offsets = [56, 0], sizes = [8, 32], strides = [1, 1]} : vector<64x32xf32> to vector<8x32xf32>
    %cst_22 = arith.constant dense<0.000000e+00> : vector<8x32xf32>
    %44 = tpu.matmul %42, %6, %cst_22 {dimension_numbers = #tpu.dot_dimension_numbers<[1], [0], [0], [1], [0, 0, 1, 1], [], []>} : vector<8x32xf32>, vector<32x32xf32>, vector<8x32xf32> -> vector<8x32xf32>
    %45 = arith.addf %43, %44 : vector<8x32xf32>
    %cst_23 = arith.constant 0.000000e+00 : f32
    %46 = vector.broadcast %cst_23 : f32 to vector<8x32xf32>
    %47 = arith.maximumf %45, %46 : vector<8x32xf32>
    %c0_24 = arith.constant 0 : index
    %c0_25 = arith.constant 0 : index
    %48 = vector.load %arg4[%c0_24, %c0_25] : memref<32x128xf32, #tpu.memory_space<vmem>>, vector<32x128xf32>
    %cst_26 = arith.constant dense<0.000000e+00> : vector<8x128xf32>
    %49 = tpu.matmul %47, %48, %cst_26 {dimension_numbers = #tpu.dot_dimension_numbers<[1], [0], [0], [1], [0, 0, 1, 1], [], []>} : vector<8x32xf32>, vector<32x128xf32>, vector<8x128xf32> -> vector<8x128xf32>
    %c0_27 = arith.constant 0 : index
    %c0_28 = arith.constant 0 : index
    %50 = vector.load %arg5[%c0_27, %c0_28] : memref<8x128xf32, #tpu.memory_space<vmem>>, vector<8x128xf32>
    tpu.vector_store %arg5[%c0_27, %c0_28], %49 {strides = array<i32>} : memref<8x128xf32, #tpu.memory_space<vmem>>, vector<8x128xf32>,
    return
  }
}

</mosaic_0001>

<bundles_post_ra>
// kernel: tpu_custom_call.1
= control target key start
LH: loop header
LB: loop body
LE: loop exit
PB: predicated region body
PF: predicated region fallthrough
CT: control target
= control target key end

     0   :  { %vm38_vm0 = vcmask 130048   ;;  %v1138_v3 = vmov 0.0|0.0   ;;  %vm1139_vm1 = vmmov 0   ;;  %v1140_v10 = vmov 0.0   ;;  %s1327_s0 = inlined_call_operand.vmem [shape: f32[64,16], index: 0, kind: input, shape index: {}]   ;;  %s1328_s1 = inlined_call_operand.vmem [shape: f32[16,32], index: 1, kind: input, shape index: {}]   ;;  %s1329_s2 = inlined_call_operand.vmem [shape: f32[1,32], index: 2, kind: input, shape index: {}]   ;;  %s1330_s3 = inlined_call_operand.vmem [shape: f32[32,32], index: 3, kind: input, shape index: {}]   ;;  %s1331_s4 = inlined_call_operand.vmem [shape: f32[32,128], index: 4, kind: input, shape index: {}]   ;;  %s1332_s5 = inlined_call_operand.hbm [shape: f32[8,128], index: 5, kind: output, shape index: {}]  }
   0x1   :  { %v29_v0 = vld [vmem:[%s1328_s1] sm:$0xff]  ;;  %v30_v1 = vld [vmem:[%s1328_s1 + $0x8] sm:$0xff]  ;;  %1056 = vmatprep.subr.bf16.mxu1 %v1138_v3  ;;  %v170_v8 = vld [vmem:[%s1330_s3 + $0x10] sm:$0xff]  ;;  %961 = vmatprep.mubr.msk.f32.mxu1 %vm1139_vm1, %v1140_v10 }
   0x2   :  { %v168_v2 = vld [vmem:[%s1330_s3] sm:$0xff]  ;;  %v1052_v4 = vpack.c.bf16 %v30_v1, %v29_v0  ;;  %v169_v5 = vld [vmem:[%s1330_s3 + $0x8] sm:$0xff]  ;;  %v171_v9 = vld [vmem:[%s1330_s3 + $0x18] sm:$0xff] }
   0x3   :  { %v21_v6 = vld [vmem:[%s1327_s0] sm:$0xff]  ;;  %v1188_v7 = vpack.c.bf16 %v169_v5, %v168_v2 }
   0x4   :  { %941 = vmatprep.mubr.msk.f32.mxu0 %vm38_vm0, %v21_v6 }
   0x5   :  { %10 = vsyncpa [#allocation3], 0  ;;  %1053 = vmatprep.subr.bf16.mxu0 %v1052_v4  ;;  %1058 = vmatpush3.bf16.msra.mxu1 %v1188_v7  ;;  %v22_v11 = vld [vmem:[%s1327_s0 + $0x8] sm:$0xff]  ;;  %v1203_v12 = vpack.c.bf16 %v171_v9, %v170_v8  ;;  %v23_v13 = vld [vmem:[%s1327_s0 + $0x10] sm:$0xff]  ;;  %vm172_vm2 = vcmask 261120   ;;  %s1141_s27 = smov [#allocation2]  }
   0x6   :  { %1055 = vmatpush3.bf16.msra.mxu0 %v1052_v4  ;;  %1059 = vmatprep.subr.bf16.mxu1 %v1138_v3  ;;  %v24_v14 = vld [vmem:[%s1327_s0 + $0x18] sm:$0xff]  ;;  %v25_v15 = vld [vmem:[%s1327_s0 + $0x20] sm:$0xff]  ;;  %v26_v16 = vld [vmem:[%s1327_s0 + $0x28] sm:$0xff]  ;;  %s857_s1 = sshll.u32 %s1141_s27, 4  ;;  %s858_s1 = int_to_ptr.vmem [resolvable:$true] %s857_s1 }
   0x7   :  { %1068 = vmatprep.subr.bf16.mxu0 %v1138_v3  ;;  %v27_v17 = vld [vmem:[%s1327_s0 + $0x30] sm:$0xff]  ;;  %v28_v18 = vld [vmem:[%s1327_s0 + $0x38] sm:$0xff]  ;;  %v1250_v19 = vld [vmem:[%s1329_s2] ss:$0 sm:$0xff]  ;;  %s1114_s28 = scalar_lea.vmem %s858_s1, 128  ;;  %p1119_p1 = scmp.lt.s32.totalorder %s858_s1, %s858_s1 }
   0x8   :  { %v773_v58 = vld [vmem:[%s1331_s4] sm:$0xff]  ;;  %v774_v59 = vld [vmem:[%s1331_s4 + $0x8] sm:$0xff]  ;;  %v775_v2 = vld [vmem:[%s1331_s4 + $0x10] sm:$0xff]  ;;  %p1115_p0 = scmp.ne.s32.totalorder %s858_s1, %s1114_s28  ;;  %p1120_p2 = scmp.lt.s32.totalorder %s1114_s28, %s1114_s28 }
   0x9   :  { %942 = vmatmul.mubr.msk.f32.vlgmr.msra.gmra.mrb[0].mxu0 %vm38_vm0, %v22_v11  ;;  %1061 = vmatpush3.bf16.msra.mxu1 %v1203_v12  ;;  %v1105_v60 = vpack.c.bf16 %v774_v59, %v773_v58  ;;  %v776_v4 = vld [vmem:[%s1331_s4 + $0x18] sm:$0xff] }
   0xa   :  { %1070 = vmatpush3.bf16.msra.mxu0 %v1188_v7  ;;  %1062 = vmatprep.subr.bf16.mxu1 %v1138_v3  ;;  %v1108_v5 = vpack.c.bf16 %v776_v4, %v775_v2  ;;  %p1121_p3 = por %p1120_p2, %p1119_p1 }
   0xb   :  { %1071 = vmatprep.subr.bf16.mxu0 %v1138_v3  ;;  %944 = vmatprep.mubr.msk.f32.mxu0 %vm38_vm0, %v23_v13 }
   0xc   :  { %962 = vmatmul.mubr.f32.vlgmr.msra.gmra.mrb[0].mxu1 %v1140_v10  ;;  %p1122_p4 = pnand %p1121_p3, %p1115_p0 }
   0xd   :  { %1064 = vmatpush3.bf16.msra.mxu1 %v1188_v7  ;;  %972 = vmatprep.mubr.msk.f32.mxu1 %vm1139_vm1, %v1140_v10 }
   0xe   :  { %1065 = vmatprep.subr.bf16.mxu1 %v1138_v3  ;;  %1073 = vmatpush3.bf16.msra.mxu0 %v1203_v12 }
   0xf   :  { %1080 = vmatprep.subr.bf16.mxu0 %v1138_v3  ;;  %945 = vmatmul.mubr.msk.f32.gmra.mrb[2].mxu0 %vm38_vm0, %v24_v14 }
  0x10   :  { %947 = vmatprep.mubr.msk.f32.mxu0 %vm38_vm0, %v25_v15 }
  0x11   :  { %1067 = vmatpush3.bf16.msra.mxu1 %v1203_v12 }
  0x12   :  { %1074 = vmatprep.subr.bf16.mxu1 %v1138_v3 }
  0x13   :  { %948 = vmatmul.mubr.msk.f32.gmra.mrb[4].mxu0 %vm38_vm0, %v26_v16 }
  0x14   :  { %950 = vmatprep.mubr.msk.f32.mxu0 %vm38_vm0, %v27_v17 }
  0x17   :  { %951 = vmatmul.mubr.msk.f32.gmra.mrb[6].mxu0 %vm38_vm0, %v28_v18 }
  0x18   :  { %983 = vmatprep.mubr.msk.f32.mxu0 %vm1139_vm1, %v1140_v10 }
  0xdc   :  { %v943_v20 = vpop.f32.mrb[0].mxu0 }
  0xdd   :  { %v129_v21 = vpop.f32.mrb[1].mxu0  ;;  %v135_v33 = vadd.f32 %v943_v20, %v1250_v19 }
  0xde   :  { %v130_v22 = vadd.f32 %v1250_v19, %v129_v21 }
  0xdf   :  { %v242_v23 = vpop.f32.mrb[0].mxu1 }
  0xe0   :  { %v246_v24 = vadd.f32 %v242_v23, %v130_v22  ;;  %v963_v25 = vpop.f32.mrb[1].mxu1 }
  0xe2   :  { %v247_v26 = vmax.f32 %v246_v24, 0.0  ;;  %v946_v27 = vpop.f32.mrb[2].mxu0 }
  0xe3   :  { %v139_v28 = vpop.f32.mrb[3].mxu0  ;;  %v145_v43 = vadd.f32 %v946_v27, %v1250_v19 }
  0xe4   :  { %973 = vmatmul.mubr.msk.f32.vlgmr.msra.gmra.mrb[2].mxu1 %vm172_vm2, %v247_v26  ;;  %v140_v38 = vadd.f32 %v1250_v19, %v139_v28 }
  0xe5   :  { %1076 = vmatpush3.bf16.msra.mxu1 %v1188_v7  ;;  %994 = vmatprep.mubr.msk.f32.mxu1 %vm1139_vm1, %v1140_v10 }
  0xe6   :  { %1077 = vmatprep.subr.bf16.mxu1 %v1138_v3  ;;  %v949_v29 = vpop.f32.mrb[4].mxu0 }
  0xe7   :  { %v149_v30 = vpop.f32.mrb[5].mxu0  ;;  %v155_v53 = vadd.f32 %v949_v29, %v1250_v19 }
  0xe8   :  { %v150_v48 = vadd.f32 %v1250_v19, %v149_v30 }
  0xe9   :  { %1079 = vmatpush3.bf16.msra.mxu1 %v1203_v12 }
  0xea   :  { %1086 = vmatprep.subr.bf16.mxu1 %v1138_v3  ;;  %v1260_v31 = vpop.f32.mrb[6].mxu0 }
  0xeb   :  { %v159_v32 = vpop.f32.mrb[7].mxu0 }
  0xec   :  { %v160_v61 = vadd.f32 %v1250_v19, %v159_v32 }
 0x1b7   :  { %v317_v34 = vpop.f32.mrb[2].mxu1 }
 0x1b8   :  { %v321_v35 = vadd.f32 %v317_v34, %v135_v33  ;;  %v974_v36 = vpop.f32.mrb[3].mxu1 }
 0x1ba   :  { %v322_v37 = vmax.f32 %v321_v35, 0.0 }
 0x1bc   :  { %984 = vmatmul.mubr.msk.f32.vlgmr.msra.gmra.mrb[8].mxu0 %vm172_vm2, %v322_v37 }
 0x1bd   :  { %1082 = vmatpush3.bf16.msra.mxu0 %v1188_v7  ;;  %1005 = vmatprep.mubr.msk.f32.mxu0 %vm1139_vm1, %v1140_v10 }
 0x1be   :  { %1083 = vmatprep.subr.bf16.mxu0 %v1138_v3 }
 0x1c1   :  { %1085 = vmatpush3.bf16.msra.mxu0 %v1203_v12 }
 0x1c2   :  { %1092 = vmatprep.subr.bf16.mxu0 %v1138_v3 }
 0x28f   :  { %v392_v39 = vpop.f32.mrb[8].mxu0 }
 0x290   :  { %v396_v40 = vadd.f32 %v392_v39, %v140_v38  ;;  %v985_v41 = vpop.f32.mrb[9].mxu0 }
 0x292   :  { %v397_v42 = vmax.f32 %v396_v40, 0.0 }
 0x294   :  { %995 = vmatmul.mubr.msk.f32.vlgmr.msra.gmra.mrb[4].mxu1 %vm172_vm2, %v397_v42 }
 0x295   :  { %1088 = vmatpush3.bf16.msra.mxu1 %v1188_v7  ;;  %1016 = vmatprep.mubr.msk.f32.mxu1 %vm1139_vm1, %v1140_v10 }
 0x296   :  { %1089 = vmatprep.subr.bf16.mxu1 %v1138_v3 }
 0x299   :  { %1091 = vmatpush3.bf16.msra.mxu1 %v1203_v12 }
 0x29a   :  { %1098 = vmatprep.subr.bf16.mxu1 %v1138_v3 }
 0x367   :  { %v467_v44 = vpop.f32.mrb[4].mxu1 }
 0x368   :  { %v471_v45 = vadd.f32 %v467_v44, %v145_v43  ;;  %v996_v46 = vpop.f32.mrb[5].mxu1 }
 0x36a   :  { %v472_v47 = vmax.f32 %v471_v45, 0.0 }
 0x36c   :  { %1006 = vmatmul.mubr.msk.f32.vlgmr.msra.gmra.mrb[10].mxu0 %vm172_vm2, %v472_v47 }
 0x36d   :  { %1094 = vmatpush3.bf16.msra.mxu0 %v1188_v7  ;;  %1027 = vmatprep.mubr.msk.f32.mxu0 %vm1139_vm1, %v1140_v10 }
 0x36e   :  { %1095 = vmatprep.subr.bf16.mxu0 %v1138_v3 }
 0x371   :  { %1097 = vmatpush3.bf16.msra.mxu0 %v1203_v12 }
 0x372   :  { %1104 = vmatprep.subr.bf16.mxu0 %v1138_v3 }
 0x43f   :  { %v542_v49 = vpop.f32.mrb[10].mxu0 }
 0x440   :  { %v546_v50 = vadd.f32 %v542_v49, %v150_v48  ;;  %v1007_v51 = vpop.f32.mrb[11].mxu0 }
 0x442   :  { %v547_v52 = vmax.f32 %v546_v50, 0.0 }
 0x444   :  { %1017 = vmatmul.mubr.msk.f32.vlgmr.msra.gmra.mrb[6].mxu1 %vm172_vm2, %v547_v52 }
 0x445   :  { %1100 = vmatpush3.bf16.msra.mxu1 %v1188_v7  ;;  %1038 = vmatprep.mubr.msk.f32.mxu1 %vm1139_vm1, %v1140_v10 }
 0x446   :  { %1101 = vmatprep.subr.bf16.mxu1 %v1138_v3 }
 0x449   :  { %1103 = vmatpush3.bf16.msra.mxu1 %v1203_v12 }
 0x517   :  { %v617_v54 = vpop.f32.mrb[6].mxu1 }
 0x518   :  { %v621_v55 = vadd.f32 %v617_v54, %v155_v53  ;;  %v1018_v56 = vpop.f32.mrb[7].mxu1 }
 0x51a   :  { %v622_v57 = vmax.f32 %v621_v55, 0.0 }
 0x51c   :  { %1028 = vmatmul.mubr.msk.f32.vlgmr.msra.gmra.mrb[12].mxu0 %vm172_vm2, %v622_v57 }
 0x51d   :  { %1049 = vmatprep.mubr.msk.f32.mxu0 %vm1139_vm1, %v1140_v10  ;;  %1106 = vmatpush3.bf16.msra.mxu0 %v1105_v60 }
 0x51e   :  { %1107 = vmatprep.subr.bf16.mxu0 %v1138_v3  ;;  %v165_v3 = vadd.f32 %v1260_v31, %v1250_v19 }
 0x521   :  { %1109 = vmatpush3.bf16.msra.mxu0 %v1108_v5 }
 0x5ef   :  { %v692_v62 = vpop.f32.mrb[12].mxu0 }
 0x5f0   :  { %v696_v63 = vadd.f32 %v692_v62, %v160_v61  ;;  %v1029_v0 = vpop.f32.mrb[13].mxu0 }
 0x5f2   :  { %v697_v1 = vmax.f32 %v696_v63, 0.0 }
 0x5f4   :  { %1039 = vmatmul.mubr.msk.f32.vlgmr.msra.gmra.mrb[8].mxu1 %vm172_vm2, %v697_v1 }
 0x6c7   :  { %v767_v6 = vpop.f32.mrb[8].mxu1 }
 0x6c8   :  { %v771_v7 = vadd.f32 %v767_v6, %v165_v3  ;;  %v1040_v8 = vpop.f32.mrb[9].mxu1 }
 0x6ca   :  { %v772_v9 = vmax.f32 %v771_v7, 0.0 }
 0x6cc   :  { %1050 = vmatmul.mubr.msk.f32.vlgmr.msra.gmra.mrb[14].mxu0 %vm172_vm2, %v772_v9 }
 0x79f   :  { %v846_v10 = vpop.f32.mrb[14].mxu0 }
 0x7a0   :  { %850 = vst [vmem:[#allocation2] sm:$0xff] %v846_v10  ;;  %v1051_v11 = vpop.f32.mrb[15].mxu0 }
 0x7a1   :  { %1125 = shalt.err (!%p1122_p4)
}
 0x7a2   :  { %s1126_s30 = scalar_lea.hbm %s1332_s5, 128 }
 0x7a3   :  { %p1127_p5 = scmp.ne.s32.totalorder %s1332_s5, %s1126_s30  ;;  %p1130_p6 = scmp.lt.u32.totalorder %s1126_s30, %s1332_s5 }
 0x7a5   :  { %p1132_p7 = pnand %p1130_p6, %p1127_p5 }
 0x7a7   :  { %1135 = shalt.err (!%p1132_p7)
}
 0x7a8   :  { %860 = dma.vmem_to_hbm [thread:$0]  %s858_s1, 128, %s1332_s5, [#allocation3]  }
 0x7a9   :  { %1136 = dma.done.wait [#allocation3], 128  }
 0x7aa   :  { %1137 = vsyncadd [#allocation3], 4294967168 }
 0x7ab   :  { %864 = vsyncpa [#allocation3], 1 }

</bundles_post_ra>
